<compile_context>
chip_gen: v6e
topology: v6e:2x2x1
jax: 0.10.0
libtpu: 0.0.40
codegen_flags: <defaults>
</compile_context>

<pallas_src>
import math
from functools import partial

import jax
import jax.numpy as jnp
from jax import lax
from jax.experimental import pallas as pl
from jax.experimental.pallas import tpu as pltpu

_VMEM_LIMIT = 48 * 1024 * 1024  # below v7x's 64 MiB physical; plenty of headroom


# ------------------------------ tiling helper ------------------------------ #

def _choose_tile(dim, preferred, align):
    """Largest tile <= preferred that is a multiple of `align` and divides `dim`.

    If dim <= preferred, the full extent is used. If no aligned divisor exists
    (dim itself not a multiple of `align`), fall back to the full extent — the
    (8,128) rule still allows full-extent blocks.
    """
    if dim <= preferred:
        return dim
    t = (preferred // align) * align
    while t >= align:
        if dim % t == 0:
            return t
        t -= align
    return dim


# --------------------- fused shared-weight QKV projection ------------------- #

def _qkv_linear_kernel(xq_ref, xk_ref, xv_ref, w_ref, b_ref,
                       oq_ref, ok_ref, ov_ref,
                       accq, acck, accv, *, q_scale):
    @pl.when(pl.program_id(2) == 0)
    def _():
        accq[...] = jnp.zeros_like(accq)
        acck[...] = jnp.zeros_like(acck)
        accv[...] = jnp.zeros_like(accv)

    w = w_ref[...]  # shared weight block, loaded once, used three times
    accq[...] += jnp.dot(xq_ref[...], w, preferred_element_type=jnp.float32)
    acck[...] += jnp.dot(xk_ref[...], w, preferred_element_type=jnp.float32)
    accv[...] += jnp.dot(xv_ref[...], w, preferred_element_type=jnp.float32)

    @pl.when(pl.program_id(2) == pl.num_programs(2) - 1)
    def _():
        bias = b_ref[...].astype(jnp.float32)
        # 1/sqrt(dk) folded into Q here (hidden under the matmul pipeline).
        oq_ref[...] = ((accq[...] + bias) * q_scale).astype(oq_ref.dtype)
        ok_ref[...] = (acck[...] + bias).astype(ok_ref.dtype)
        ov_ref[...] = (accv[...] + bias).astype(ov_ref.dtype)


def _qkv_linear(xq, xk, xv, w_t, b, *, q_scale, out_dtype,
                tm=512, tn=512, tk=512):
    M, d_in = xq.shape
    d_out = w_t.shape[1]
    tm = _choose_tile(M, tm, 8)
    tn = _choose_tile(d_out, tn, 128)
    tk = _choose_tile(d_in, tk, 128)

    x_spec = pl.BlockSpec((tm, tk), lambda i, j, kk: (i, kk))
    o_spec = pl.BlockSpec((tm, tn), lambda i, j, kk: (i, j))
    return pl.pallas_call(
        partial(_qkv_linear_kernel, q_scale=q_scale),
        out_shape=[jax.ShapeDtypeStruct((M, d_out), out_dtype)] * 3,
        grid_spec=pltpu.PrefetchScalarGridSpec(
            num_scalar_prefetch=0,
            grid=(M // tm, d_out // tn, d_in // tk),
            in_specs=[x_spec, x_spec, x_spec,
                      pl.BlockSpec((tk, tn), lambda i, j, kk: (kk, j)),
                      pl.BlockSpec((1, tn), lambda i, j, kk: (0, j))],
            out_specs=[o_spec, o_spec, o_spec],
            scratch_shapes=[pltpu.VMEM((tm, tn), jnp.float32)] * 3),
        compiler_params=pltpu.CompilerParams(
            dimension_semantics=("parallel", "parallel", "arbitrary"),
            vmem_limit_bytes=_VMEM_LIMIT),
    )(xq, xk, xv, w_t, b.reshape(1, d_out))


# --------------------------- single tiled linear ---------------------------- #

def _linear_kernel(x_ref, w_ref, b_ref, o_ref, acc_ref):
    @pl.when(pl.program_id(2) == 0)
    def _():
        acc_ref[...] = jnp.zeros_like(acc_ref)

    acc_ref[...] += jnp.dot(x_ref[...], w_ref[...],
                            preferred_element_type=jnp.float32)

    @pl.when(pl.program_id(2) == pl.num_programs(2) - 1)
    def _():
        o_ref[...] = (acc_ref[...] + b_ref[...].astype(jnp.float32)).astype(o_ref.dtype)


def _linear(x2d, w_t, b, *, out_dtype, tm=512, tn=512, tk=512):
    M, d_in = x2d.shape
    d_out = w_t.shape[1]
    tm = _choose_tile(M, tm, 8)
    tn = _choose_tile(d_out, tn, 128)
    tk = _choose_tile(d_in, tk, 128)

    return pl.pallas_call(
        _linear_kernel,
        out_shape=jax.ShapeDtypeStruct((M, d_out), out_dtype),
        grid_spec=pltpu.PrefetchScalarGridSpec(
            num_scalar_prefetch=0,
            grid=(M // tm, d_out // tn, d_in // tk),
            in_specs=[pl.BlockSpec((tm, tk), lambda i, j, kk: (i, kk)),
                      pl.BlockSpec((tk, tn), lambda i, j, kk: (kk, j)),
                      pl.BlockSpec((1, tn), lambda i, j, kk: (0, j))],
            out_specs=pl.BlockSpec((tm, tn), lambda i, j, kk: (i, j)),
            scratch_shapes=[pltpu.VMEM((tm, tn), jnp.float32)]),
        compiler_params=pltpu.CompilerParams(
            dimension_semantics=("parallel", "parallel", "arbitrary"),
            vmem_limit_bytes=_VMEM_LIMIT),
    )(x2d, w_t, b.reshape(1, d_out))


# -------------------------------- attention --------------------------------- #
# 1/sqrt(dk) was already folded into Q; softmax statistics stay f32.

def _attention_kernel_headgrid(q_ref, k_ref, v_ref, o_ref):
    # One grid step = (batch, head, query tile). Blocks are lane-aligned (dk>=128).
    q = q_ref[0]                                           # (tq, dk)
    k = k_ref[0]                                           # (S,  dk)
    v = v_ref[0]                                           # (S,  dk)
    s = lax.dot_general(q, k, (((1,), (1,)), ((), ())),
                        preferred_element_type=jnp.float32)  # (tq, S) f32
    m = jnp.max(s, axis=-1, keepdims=True)
    p = jnp.exp(s - m)
    l = jnp.sum(p, axis=-1, keepdims=True)
    acc = jnp.dot(p.astype(v.dtype), v, preferred_element_type=jnp.float32)
    o_ref[0] = (acc * pl.reciprocal(l, approx=False)).astype(o_ref.dtype)


def _attention_kernel_packed(q_ref, k_ref, v_ref, o_ref, *, h, dk):
    # One grid step = (batch, query tile), all heads unrolled; dk < 128 so head
    # slices are sub-lane (relayout / masked-store cost accepted knowingly).
    q = q_ref[0]                                           # (tq, d_model)
    k = k_ref[0]                                           # (S,  d_model)
    v = v_ref[0]                                           # (S,  d_model)
    for hh in range(h):
        sl = slice(hh * dk, (hh + 1) * dk)
        qh, kh, vh = q[:, sl], k[:, sl], v[:, sl]
        s = lax.dot_general(qh, kh, (((1,), (1,)), ((), ())),
                            preferred_element_type=jnp.float32)  # (tq, S) f32
        m = jnp.max(s, axis=-1, keepdims=True)
        p = jnp.exp(s - m)
        l = jnp.sum(p, axis=-1, keepdims=True)
        acc = jnp.dot(p.astype(vh.dtype), vh, preferred_element_type=jnp.float32)
        # Direct per-head store: frees this head's live ranges immediately;
        # together the h stores cover the lane-dense (tq, d_model) output block.
        o_ref[0, :, pl.ds(hh * dk, dk)] = (
            acc * pl.reciprocal(l, approx=False)).astype(o_ref.dtype)


def _attention(Qp, Kp, Vp, *, h, tq=256):
    B, S, d_model = Qp.shape
    dk = d_model // h
    tq = _choose_tile(S, tq, 8)

    if dk % 128 == 0:
        # Heads on the grid: lane-aligned blocks, B*h query-tiled steps to
        # pipeline / shard across TensorCores; K/V resident along the q axis.
        qo_spec = pl.BlockSpec((1, tq, dk), lambda b, hh, qi: (b, qi, hh))
        kv_spec = pl.BlockSpec((1, S, dk), lambda b, hh, qi: (b, 0, hh))
        return pl.pallas_call(
            _attention_kernel_headgrid,
            out_shape=jax.ShapeDtypeStruct((B, S, d_model), Qp.dtype),
            grid=(B, h, S // tq),
            in_specs=[qo_spec, kv_spec, kv_spec],
            out_specs=qo_spec,
            compiler_params=pltpu.CompilerParams(
                dimension_semantics=("parallel", "parallel", "parallel"),
                vmem_limit_bytes=_VMEM_LIMIT),
        )(Qp, Kp, Vp)

    # dk < 128: keep heads packed in the lane-dense d_model block.
    q_spec = pl.BlockSpec((1, tq, d_model), lambda b, qi: (b, qi, 0))
    kv_spec = pl.BlockSpec((1, S, d_model), lambda b, qi: (b, 0, 0))
    return pl.pallas_call(
        partial(_attention_kernel_packed, h=h, dk=dk),
        out_shape=jax.ShapeDtypeStruct((B, S, d_model), Qp.dtype),
        grid=(B, S // tq),
        in_specs=[q_spec, kv_spec, kv_spec],
        out_specs=q_spec,
        compiler_params=pltpu.CompilerParams(
            dimension_semantics=("parallel", "parallel"),
            vmem_limit_bytes=_VMEM_LIMIT),
    )(Qp, Kp, Vp)


# ------------------------------ module wrapper ------------------------------ #

def multi_headed_attention_forward(q, k, v, w, b, h, compute_dtype=jnp.bfloat16):
    """q,k,v: (B,S,d_model); w: (d_model,d_model) torch-style (out,in); b: (d_model,).

    compute_dtype (default bf16): storage/MXU-operand dtype for activations and
    weights — cast ONCE here so HBM traffic is halved. Accumulation, bias add
    and softmax statistics stay f32. Pass compute_dtype=None for pure f32.
    """
    B, S, d_model = q.shape
    dk = d_model // h
    out_dtype = q.dtype

    w_t = w.T                                  # torch Linear computes x @ W^T
    b_f32 = b.astype(jnp.float32)
    if compute_dtype is not None and compute_dtype != q.dtype:
        q = q.astype(compute_dtype)
        k = k.astype(compute_dtype)
        v = v.astype(compute_dtype)
        w_t = w_t.astype(compute_dtype)
    act_dtype = q.dtype

    M = B * S
    q2 = q.reshape(M, d_model)
    k2 = k.reshape(M, d_model)
    v2 = v.reshape(M, d_model)

    # Fused shared-weight Q/K/V projection (scale folded into Q's finalize).
    Qp, Kp, Vp = _qkv_linear(q2, k2, v2, w_t, b_f32,
                             q_scale=1.0 / math.sqrt(dk), out_dtype=act_dtype)
    Qp = Qp.reshape(B, S, d_model)
    Kp = Kp.reshape(B, S, d_model)
    Vp = Vp.reshape(B, S, d_model)

    # Attention in (B, S, d_model) layout: heads are lane slices, output is
    # already "concat heads".
    ctx = _attention(Qp, Kp, Vp, h=h)

    # Shared output projection (same weight/bias, per the PyTorch module).
    out = _linear(ctx.reshape(M, d_model), w_t, b_f32, out_dtype=out_dtype)
    return out.reshape(B, S, d_model)


# -------------------------------- reference ---------------------------------- #

def _reference(q, k, v, w, b, h):
    B, S, d_model = q.shape
    dk = d_model // h

    def project(x):
        y = x @ w.T + b
        return y.reshape(B, S, h, dk).transpose(0, 2, 1, 3)

    Q, K, V = project(q), project(k), project(v)
    s = jnp.einsum("bhqd,bhkd->bhqk", Q, K) / math.sqrt(dk)
    p = jax.nn.softmax(s, axis=-1)
    ctx = jnp.einsum("bhqk,bhkd->bhqd", p, V)
    x = ctx.transpose(0, 2, 1, 3).reshape(B, S, d_model)
    return x @ w.T + b


# ----------------------------------- main ------------------------------------ #

if __name__ == "__main__":
    key = jax.random.PRNGKey(0)

    def make_case(key, B, S, d_model):
        kq, kk, kv, kw, kb = jax.random.split(key, 5)
        q = jax.random.normal(kq, (B, S, d_model), dtype=jnp.float32)
        k = jax.random.normal(kk, (B, S, d_model), dtype=jnp.float32)
        v = jax.random.normal(kv, (B, S, d_model), dtype=jnp.float32)
        bound = 1.0 / math.sqrt(d_model)  # torch Linear-style uniform init
        w = jax.random.uniform(kw, (d_model, d_model), jnp.float32, -bound, bound)
        b = jax.random.uniform(kb, (d_model,), jnp.float32, -bound, bound)
        return q, k, v, w, b

    key1, key2 = jax.random.split(key)

    # Case 1: dk < 128 (packed-heads attention path). B=2, S=8, d_model=32, h=4.
    q, k, v, w, b = make_case(key1, 2, 8, 32)
    ref = _reference(q, k, v, w, b, 4)

    out_bf16 = jax.block_until_ready(
        multi_headed_attention_forward(q, k, v, w, b, 4))            # bf16 default
    assert out_bf16.shape == (2, 8, 32)
    assert jnp.allclose(out_bf16, ref, atol=5e-2, rtol=5e-2), "bf16 mismatch (case 1)"

    out_f32 = jax.block_until_ready(
        multi_headed_attention_forward(q, k, v, w, b, 4, compute_dtype=None))
    assert jnp.allclose(out_f32, ref, atol=2e-3, rtol=2e-3), "f32 mismatch (case 1)"

    # Case 2: dk == 128 (heads-on-grid attention path). B=2, S=16, d_model=256, h=2.
    q2, k2, v2, w2, b2 = make_case(key2, 2, 16, 256)
    ref2 = _reference(q2, k2, v2, w2, b2, 2)
    out2 = jax.block_until_ready(
        multi_headed_attention_forward(q2, k2, v2, w2, b2, 2))
    assert out2.shape == (2, 16, 256)
    assert jnp.allclose(out2, ref2, atol=5e-2, rtol=5e-2), "bf16 mismatch (case 2)"

    print("KERNEL_OK")
</pallas_src>

<mosaic_0001>
module attributes {stable_mosaic.version = 11 : i64} {
  func.func @_qkv_linear_kernel(%arg0: i32, %arg1: i32, %arg2: i32, %arg3: memref<16x32xbf16, #tpu.memory_space<vmem>>, %arg4: memref<16x32xbf16, #tpu.memory_space<vmem>>, %arg5: memref<16x32xbf16, #tpu.memory_space<vmem>>, %arg6: memref<32x32xbf16, #tpu.memory_space<vmem>>, %arg7: memref<1x32xf32, #tpu.memory_space<vmem>>, %arg8: memref<16x32xbf16, #tpu.memory_space<vmem>>, %arg9: memref<16x32xbf16, #tpu.memory_space<vmem>>, %arg10: memref<16x32xbf16, #tpu.memory_space<vmem>>, %arg11: memref<16x32xf32, #tpu.memory_space<vmem>>, %arg12: memref<16x32xf32, #tpu.memory_space<vmem>>, %arg13: memref<16x32xf32, #tpu.memory_space<vmem>>) attributes {dimension_semantics = [#tpu.dimension_semantics<parallel>, #tpu.dimension_semantics<parallel>, #tpu.dimension_semantics<arbitrary>], iteration_bounds = array<i64: 1, 1, 1>, scalar_prefetch = 0 : i64, scratch_operands = 3 : i64, tpu.core_type = #tpu.core_type<tc>, window_params = [{transform_indices = @transform_0, window_bounds = array<i64: 16, 32>}, {transform_indices = @transform_1, window_bounds = array<i64: 16, 32>}, {transform_indices = @transform_2, window_bounds = array<i64: 16, 32>}, {transform_indices = @transform_3, window_bounds = array<i64: 32, 32>}, {transform_indices = @transform_4, window_bounds = array<i64: 1, 32>}, {transform_indices = @transform_5, window_bounds = array<i64: 16, 32>}, {transform_indices = @transform_6, window_bounds = array<i64: 16, 32>}, {transform_indices = @transform_7, window_bounds = array<i64: 16, 32>}]} {
    %c0_i32 = arith.constant 0 : i32
    %0 = arith.cmpi eq, %arg2, %c0_i32 : i32
    %1 = arith.extui %0 : i1 to i32
    %c0_i32_0 = arith.constant 0 : i32
    %2 = arith.cmpi ne, %1, %c0_i32_0 : i32
    scf.if %2 {
      %cst_24 = arith.constant 0.000000e+00 : f32
      %22 = vector.broadcast %cst_24 : f32 to vector<16x32xf32>
      %c0_25 = arith.constant 0 : index
      %c0_26 = arith.constant 0 : index
      %23 = vector.load %arg11[%c0_25, %c0_26] : memref<16x32xf32, #tpu.memory_space<vmem>>, vector<16x32xf32>
      tpu.vector_store %arg11[%c0_25, %c0_26], %22 {strides = array<i32>} : memref<16x32xf32, #tpu.memory_space<vmem>>, vector<16x32xf32>,
      %cst_27 = arith.constant 0.000000e+00 : f32
      %24 = vector.broadcast %cst_27 : f32 to vector<16x32xf32>
      %c0_28 = arith.constant 0 : index
      %c0_29 = arith.constant 0 : index
      %25 = vector.load %arg12[%c0_28, %c0_29] : memref<16x32xf32, #tpu.memory_space<vmem>>, vector<16x32xf32>
      tpu.vector_store %arg12[%c0_28, %c0_29], %24 {strides = array<i32>} : memref<16x32xf32, #tpu.memory_space<vmem>>, vector<16x32xf32>,
      %cst_30 = arith.constant 0.000000e+00 : f32
      %26 = vector.broadcast %cst_30 : f32 to vector<16x32xf32>
      %c0_31 = arith.constant 0 : index
      %c0_32 = arith.constant 0 : index
      %27 = vector.load %arg13[%c0_31, %c0_32] : memref<16x32xf32, #tpu.memory_space<vmem>>, vector<16x32xf32>
      tpu.vector_store %arg13[%c0_31, %c0_32], %26 {strides = array<i32>} : memref<16x32xf32, #tpu.memory_space<vmem>>, vector<16x32xf32>,
    } else {
    }
    %c0 = arith.constant 0 : index
    %c0_1 = arith.constant 0 : index
    %3 = vector.load %arg6[%c0, %c0_1] : memref<32x32xbf16, #tpu.memory_space<vmem>>, vector<32x32xbf16>
    %c0_2 = arith.constant 0 : index
    %c0_3 = arith.constant 0 : index
    %4 = vector.load %arg11[%c0_2, %c0_3] : memref<16x32xf32, #tpu.memory_space<vmem>>, vector<16x32xf32>
    %c0_4 = arith.constant 0 : index
    %c0_5 = arith.constant 0 : index
    %5 = vector.load %arg3[%c0_4, %c0_5] : memref<16x32xbf16, #tpu.memory_space<vmem>>, vector<16x32xbf16>
    %cst = arith.constant dense<0.000000e+00> : vector<16x32xf32>
    %6 = tpu.matmul %5, %3, %cst {dimension_numbers = #tpu.dot_dimension_numbers<[1], [0], [0], [1], [0, 0, 1, 1], [], []>} : vector<16x32xbf16>, vector<32x32xbf16>, vector<16x32xf32> -> vector<16x32xf32>
    %7 = arith.addf %4, %6 : vector<16x32xf32>
    %c0_6 = arith.constant 0 : index
    %c0_7 = arith.constant 0 : index
    %8 = vector.load %arg11[%c0_6, %c0_7] : memref<16x32xf32, #tpu.memory_space<vmem>>, vector<16x32xf32>
    tpu.vector_store %arg11[%c0_6, %c0_7], %7 {strides = array<i32>} : memref<16x32xf32, #tpu.memory_space<vmem>>, vector<16x32xf32>,
    %c0_8 = arith.constant 0 : index
    %c0_9 = arith.constant 0 : index
    %9 = vector.load %arg12[%c0_8, %c0_9] : memref<16x32xf32, #tpu.memory_space<vmem>>, vector<16x32xf32>
    %c0_10 = arith.constant 0 : index
    %c0_11 = arith.constant 0 : index
    %10 = vector.load %arg4[%c0_10, %c0_11] : memref<16x32xbf16, #tpu.memory_space<vmem>>, vector<16x32xbf16>
    %cst_12 = arith.constant dense<0.000000e+00> : vector<16x32xf32>
    %11 = tpu.matmul %10, %3, %cst_12 {dimension_numbers = #tpu.dot_dimension_numbers<[1], [0], [0], [1], [0, 0, 1, 1], [], []>} : vector<16x32xbf16>, vector<32x32xbf16>, vector<16x32xf32> -> vector<16x32xf32>
    %12 = arith.addf %9, %11 : vector<16x32xf32>
    %c0_13 = arith.constant 0 : index
    %c0_14 = arith.constant 0 : index
    %13 = vector.load %arg12[%c0_13, %c0_14] : memref<16x32xf32, #tpu.memory_space<vmem>>, vector<16x32xf32>
    tpu.vector_store %arg12[%c0_13, %c0_14], %12 {strides = array<i32>} : memref<16x32xf32, #tpu.memory_space<vmem>>, vector<16x32xf32>,
    %c0_15 = arith.constant 0 : index
    %c0_16 = arith.constant 0 : index
    %14 = vector.load %arg13[%c0_15, %c0_16] : memref<16x32xf32, #tpu.memory_space<vmem>>, vector<16x32xf32>
    %c0_17 = arith.constant 0 : index
    %c0_18 = arith.constant 0 : index
    %15 = vector.load %arg5[%c0_17, %c0_18] : memref<16x32xbf16, #tpu.memory_space<vmem>>, vector<16x32xbf16>
    %cst_19 = arith.constant dense<0.000000e+00> : vector<16x32xf32>
    %16 = tpu.matmul %15, %3, %cst_19 {dimension_numbers = #tpu.dot_dimension_numbers<[1], [0], [0], [1], [0, 0, 1, 1], [], []>} : vector<16x32xbf16>, vector<32x32xbf16>, vector<16x32xf32> -> vector<16x32xf32>
    %17 = arith.addf %14, %16 : vector<16x32xf32>
    %c0_20 = arith.constant 0 : index
    %c0_21 = arith.constant 0 : index
    %18 = vector.load %arg13[%c0_20, %c0_21] : memref<16x32xf32, #tpu.memory_space<vmem>>, vector<16x32xf32>
    tpu.vector_store %arg13[%c0_20, %c0_21], %17 {strides = array<i32>} : memref<16x32xf32, #tpu.memory_space<vmem>>, vector<16x32xf32>,
    %c0_i32_22 = arith.constant 0 : i32
    %19 = arith.cmpi eq, %arg2, %c0_i32_22 : i32
    %20 = arith.extui %19 : i1 to i32
    %c0_i32_23 = arith.constant 0 : i32
    %21 = arith.cmpi ne, %20, %c0_i32_23 : i32
    scf.if %21 {
      %c0_24 = arith.constant 0 : index
      %c0_25 = arith.constant 0 : index
      %22 = vector.load %arg7[%c0_24, %c0_25] : memref<1x32xf32, #tpu.memory_space<vmem>>, vector<1x32xf32>
      %c0_26 = arith.constant 0 : index
      %c0_27 = arith.constant 0 : index
      %23 = vector.load %arg11[%c0_26, %c0_27] : memref<16x32xf32, #tpu.memory_space<vmem>>, vector<16x32xf32>
      %24 = vector.broadcast %22 : vector<1x32xf32> to vector<16x32xf32>
      %25 = arith.addf %23, %24 : vector<16x32xf32>
      %cst_28 = arith.constant 0.353553385 : f32
      %26 = vector.broadcast %cst_28 : f32 to vector<16x32xf32>
      %27 = arith.mulf %25, %26 : vector<16x32xf32>
      %28 = arith.truncf %27 : vector<16x32xf32> to vector<16x32xbf16>
      %c0_29 = arith.constant 0 : index
      %c0_30 = arith.constant 0 : index
      %29 = vector.load %arg8[%c0_29, %c0_30] : memref<16x32xbf16, #tpu.memory_space<vmem>>, vector<16x32xbf16>
      tpu.vector_store %arg8[%c0_29, %c0_30], %28 {strides = array<i32>} : memref<16x32xbf16, #tpu.memory_space<vmem>>, vector<16x32xbf16>,
      %c0_31 = arith.constant 0 : index
      %c0_32 = arith.constant 0 : index
      %30 = vector.load %arg12[%c0_31, %c0_32] : memref<16x32xf32, #tpu.memory_space<vmem>>, vector<16x32xf32>
      %31 = vector.broadcast %22 : vector<1x32xf32> to vector<16x32xf32>
      %32 = arith.addf %30, %31 : vector<16x32xf32>
      %33 = arith.truncf %32 : vector<16x32xf32> to vector<16x32xbf16>
      %c0_33 = arith.constant 0 : index
      %c0_34 = arith.constant 0 : index
      %34 = vector.load %arg9[%c0_33, %c0_34] : memref<16x32xbf16, #tpu.memory_space<vmem>>, vector<16x32xbf16>
      tpu.vector_store %arg9[%c0_33, %c0_34], %33 {strides = array<i32>} : memref<16x32xbf16, #tpu.memory_space<vmem>>, vector<16x32xbf16>,
      %c0_35 = arith.constant 0 : index
      %c0_36 = arith.constant 0 : index
      %35 = vector.load %arg13[%c0_35, %c0_36] : memref<16x32xf32, #tpu.memory_space<vmem>>, vector<16x32xf32>
      %36 = vector.broadcast %22 : vector<1x32xf32> to vector<16x32xf32>
      %37 = arith.addf %35, %36 : vector<16x32xf32>
      %38 = arith.truncf %37 : vector<16x32xf32> to vector<16x32xbf16>
      %c0_37 = arith.constant 0 : index
      %c0_38 = arith.constant 0 : index
      %39 = vector.load %arg10[%c0_37, %c0_38] : memref<16x32xbf16, #tpu.memory_space<vmem>>, vector<16x32xbf16>
      tpu.vector_store %arg10[%c0_37, %c0_38], %38 {strides = array<i32>} : memref<16x32xbf16, #tpu.memory_space<vmem>>, vector<16x32xbf16>,
    } else {
    }
    return
  }
  func.func @transform_0(%arg0: i32, %arg1: i32, %arg2: i32) -> (i32, i32) {
    %c0_i32 = arith.constant 0 : i32
    return %arg0, %arg2 : i32, i32
  }
  func.func @transform_1(%arg0: i32, %arg1: i32, %arg2: i32) -> (i32, i32) {
    %c0_i32 = arith.constant 0 : i32
    return %arg0, %arg2 : i32, i32
  }
  func.func @transform_2(%arg0: i32, %arg1: i32, %arg2: i32) -> (i32, i32) {
    %c0_i32 = arith.constant 0 : i32
    return %arg0, %arg2 : i32, i32
  }
  func.func @transform_3(%arg0: i32, %arg1: i32, %arg2: i32) -> (i32, i32) {
    %c0_i32 = arith.constant 0 : i32
    return %arg2, %arg1 : i32, i32
  }
  func.func @transform_4(%arg0: i32, %arg1: i32, %arg2: i32) -> (i32, i32) {
    %c0_i32 = arith.constant 0 : i32
    %c0_i32_0 = arith.constant 0 : i32
    return %c0_i32, %arg1 : i32, i32
  }
  func.func @transform_5(%arg0: i32, %arg1: i32, %arg2: i32) -> (i32, i32) {
    %c0_i32 = arith.constant 0 : i32
    return %arg0, %arg1 : i32, i32
  }
  func.func @transform_6(%arg0: i32, %arg1: i32, %arg2: i32) -> (i32, i32) {
    %c0_i32 = arith.constant 0 : i32
    return %arg0, %arg1 : i32, i32
  }
  func.func @transform_7(%arg0: i32, %arg1: i32, %arg2: i32) -> (i32, i32) {
    %c0_i32 = arith.constant 0 : i32
    return %arg0, %arg1 : i32, i32
  }
}

</mosaic_0001>

<bundles_post_ra>
// kernel: tpu_custom_call.1
= control target key start
LH: loop header
LB: loop body
LE: loop exit
PB: predicated region body
PF: predicated region fallthrough
CT: control target
= control target key end

     0   :  { %13 = vsyncpa [#allocation6], 0  ;;  %s725_s0 = inlined_call_operand.hbm [shape: bf16[16,32], index: 0, kind: input, shape index: {}]   ;;  %s726_s1 = inlined_call_operand.hbm [shape: bf16[16,32], index: 1, kind: input, shape index: {}]   ;;  %s727_s2 = inlined_call_operand.hbm [shape: bf16[16,32], index: 2, kind: input, shape index: {}]   ;;  %s728_s3 = inlined_call_operand.hbm [shape: bf16[32,32], index: 3, kind: input, shape index: {}]   ;;  %s729_s4 = inlined_call_operand.vmem [shape: f32[1,32], index: 4, kind: input, shape index: {}]   ;;  %s730_s5 = inlined_call_operand.hbm [shape: bf16[16,32], index: 5, kind: output, shape index: {0}]   ;;  %s731_s6 = inlined_call_operand.hbm [shape: bf16[16,32], index: 6, kind: output, shape index: {1}]   ;;  %s732_s7 = inlined_call_operand.hbm [shape: bf16[16,32], index: 7, kind: output, shape index: {2}]  }
   0x1   :  { %14 = vsyncpa [#allocation9], 0 }
   0x2   :  { %15 = vsyncpa [#allocation12], 0 }
   0x3   :  { %16 = vsyncpa [#allocation7], 0 }
   0x4   :  { %17 = vsyncpa [#allocation15], 0  ;;  %s605_s24 = smov [#allocation8]   ;;  %s606_s26 = smov [#allocation5]  }
   0x5   :  { %s35_s25 = sshll.u32 %s605_s24, 4  ;;  %s23_s27 = sshll.u32 %s606_s26, 4  ;;  %s36_s25 = int_to_ptr.vmem [resolvable:$true] %s35_s25  ;;  %s24_s27 = int_to_ptr.vmem [resolvable:$true] %s23_s27 }
   0x6   :  { %s463_s28 = scalar_lea.vmem %s36_s25, 128  ;;  %p468_p1 = scmp.lt.s32.totalorder %s36_s25, %s36_s25 }
   0x7   :  { %p464_p0 = scmp.ne.s32.totalorder %s36_s25, %s463_s28  ;;  %p469_p2 = scmp.lt.s32.totalorder %s463_s28, %s463_s28 }
   0x9   :  { %p470_p3 = por %p469_p2, %p468_p1 }
   0xb   :  { %p471_p4 = pnand %p470_p3, %p464_p0 }
   0xd   :  { %474 = shalt.err (!%p471_p4)
}
   0xe   :  { %s607_s29 = smov 64   ;;  %s608_s30 = smov 4  }
   0xf   :  { %41 = dma.hbm_to_vmem [thread:$0]  %s726_s1, 128, %s36_s25, [#allocation9], %s607_s29, %s607_s29, %s608_s30  }
  0x10   :  { %s483_s10 = scalar_lea.vmem %s24_s27, 128  ;;  %p488_p6 = scmp.lt.s32.totalorder %s24_s27, %s24_s27 }
  0x11   :  { %p484_p5 = scmp.ne.s32.totalorder %s24_s27, %s483_s10  ;;  %p489_p7 = scmp.lt.s32.totalorder %s483_s10, %s483_s10 }
  0x13   :  { %p490_p8 = por %p489_p7, %p488_p6 }
  0x15   :  { %p491_p9 = pnand %p490_p8, %p484_p5 }
  0x17   :  { %494 = shalt.err (!%p491_p9)
}
  0x18   :  { %29 = dma.hbm_to_vmem [thread:$0]  %s725_s0, 128, %s24_s27, [#allocation6], %s607_s29, %s607_s29, %s608_s30  }
  0x19   :  { %s609_s13 = smov [#allocation10]   ;;  %s610_s15 = smov [#allocation11]  }
  0x1a   :  { %s47_s14 = sshll.u32 %s609_s13, 4  ;;  %s59_s16 = sshll.u32 %s610_s15, 4  ;;  %s48_s14 = int_to_ptr.vmem [resolvable:$true] %s47_s14  ;;  %s60_s16 = int_to_ptr.vmem [resolvable:$true] %s59_s16 }
  0x1b   :  { %s503_s1 = scalar_lea.vmem %s48_s14, 128  ;;  %p508_p11 = scmp.lt.s32.totalorder %s48_s14, %s48_s14 }
  0x1c   :  { %p504_p10 = scmp.ne.s32.totalorder %s48_s14, %s503_s1  ;;  %p509_p12 = scmp.lt.s32.totalorder %s503_s1, %s503_s1 }
  0x1e   :  { %p510_p13 = por %p509_p12, %p508_p11 }
  0x20   :  { %p511_p0 = pnand %p510_p13, %p504_p10 }
  0x22   :  { %514 = shalt.err (!%p511_p0)
}
  0x23   :  { %53 = dma.hbm_to_vmem [thread:$0]  %s727_s2, 128, %s48_s14, [#allocation9], %s607_s29, %s607_s29, %s608_s30  }
  0x24   :  { %s523_s0 = scalar_lea.vmem %s60_s16, 256  ;;  %p528_p2 = scmp.lt.s32.totalorder %s60_s16, %s60_s16 }
  0x25   :  { %p524_p1 = scmp.ne.s32.totalorder %s60_s16, %s523_s0  ;;  %p529_p3 = scmp.lt.s32.totalorder %s523_s0, %s523_s0 }
  0x27   :  { %p530_p4 = por %p529_p3, %p528_p2 }
  0x29   :  { %p531_p5 = pnand %p530_p4, %p524_p1 }
  0x2b   :  { %534 = shalt.err (!%p531_p5)
}
  0x2c   :  { %65 = dma.hbm_to_vmem [thread:$0]  %s728_s3, 256, %s60_s16, [#allocation12], %s607_s29, %s607_s29, %s608_s30  }
  0x2d   :  { %595 = dma.done.wait [#allocation6], 128  }
  0x2e   :  { %596 = vsyncadd [#allocation6], 4294967168 }
  0x2f   :  { %597 = dma.done.wait [#allocation9], 256  }
  0x30   :  { %598 = vsyncadd [#allocation9], 4294967040 }
  0x31   :  { %599 = dma.done.wait [#allocation12], 256  }
  0x32   :  { %600 = vsyncadd [#allocation12], 4294967040  ;;  %vm85_vm0 = vcmask 261120   ;;  %v611_v0 = vmov 0.0   ;;  %vm612_vm1 = vmmov 0   ;;  %v450_v1 = vld [vmem:[#allocation11 + $0x8] sm:$0xff]  }
  0x33   :  { %415 = vmatprep.subr.bf16.mxu0 %v611_v0  ;;  %423 = vmatprep.subr.bf16.mxu1 %v611_v0  ;;  %86 = vst.msk [vmem:[#allocation2] sm:$0xff] %vm85_vm0, %v611_v0  ;;  %87 = vst.msk [vmem:[#allocation2 + $0x8] sm:$0xff] %vm85_vm0, %v611_v0  ;;  %v451_v2 = vld [vmem:[#allocation11] sm:$0xff]   ;;  %v452_v3 = vld [vmem:[#allocation5] sm:$0xff]   ;;  %vm304_vm2 = vcmask 257024   ;;  %s613_s21 = smov [#allocation14]  }
  0x34   :  { %88 = vst.msk [vmem:[#allocation3] sm:$0xff] %vm85_vm0, %v611_v0  ;;  %89 = vst.msk [vmem:[#allocation3 + $0x8] sm:$0xff] %vm85_vm0, %v611_v0  ;;  %419 = vmatprep.mubr.msk.bf16.mxu0 %vm612_vm1, %v611_v0  ;;  %427 = vmatprep.mubr.msk.bf16.mxu1 %vm612_vm1, %v611_v0  ;;  %v453_v4 = vld [vmem:[#allocation8] sm:$0xff]   ;;  %v454_v5 = vld [vmem:[#allocation10] sm:$0xff]   ;;  %s352_s22 = sshll.u32 %s613_s21, 4  ;;  %s353_s22 = int_to_ptr.vmem [resolvable:$true] %s352_s22 }
  0x35   :  { %90 = vst.msk [vmem:[#allocation4] sm:$0xff] %vm85_vm0, %v611_v0  ;;  %91 = vst.msk [vmem:[#allocation4 + $0x8] sm:$0xff] %vm85_vm0, %v611_v0  ;;  %416 = vmatpush3.bf16.msra.mxu0 %v450_v1  ;;  %424 = vmatpush3.bf16.msra.mxu1 %v450_v1  ;;  %v393_v24 = vld [vmem:[%s729_s4] ss:$0 sm:$0xff]  ;;  %s614_s4 = smov [#allocation13]   ;;  %s535_s24 = scalar_lea.vmem %s353_s22, 128 }
  0x36   :  { %417 = vmatprep.subr.bf16.mxu0 %v611_v0  ;;  %425 = vmatprep.subr.bf16.mxu1 %v611_v0  ;;  %s340_s23 = sshll.u32 %s614_s4, 4  ;;  %p536_p6 = scmp.ne.s32.totalorder %s353_s22, %s535_s24  ;;  %s341_s23 = int_to_ptr.vmem [resolvable:$true] %s340_s23 }
  0x37   :  { %p540_p7 = scmp.lt.s32.totalorder %s353_s22, %s353_s22  ;;  %p541_p8 = scmp.lt.s32.totalorder %s535_s24, %s535_s24 }
  0x39   :  { %418 = vmatpush3.bf16.msra.mxu0 %v451_v2  ;;  %426 = vmatpush3.bf16.msra.mxu1 %v451_v2  ;;  %p542_p9 = por %p541_p8, %p540_p7 }
  0x3a   :  { %431 = vmatprep.subr.bf16.mxu0 %v611_v0  ;;  %v96_v6 = vld [vmem:[#allocation2] sm:$0xff]  ;;  %v97_v13 = vld [vmem:[#allocation2 + $0x8] sm:$0xff] }
  0x3b   :  { %v166_v7 = vld [vmem:[#allocation3] sm:$0xff]  ;;  %v167_v15 = vld [vmem:[#allocation3 + $0x8] sm:$0xff]  ;;  %p543_p10 = pnand %p542_p9, %p536_p6 }
  0x3c   :  { %420 = vmatmul.mubr.msk.bf16.vlgmr.msra.gmra.mxu0 %vm85_vm0, %v452_v3  ;;  %428 = vmatmul.mubr.msk.bf16.vlgmr.msra.gmra.mxu1 %vm85_vm0, %v453_v4  ;;  %v223_v22 = vld [vmem:[#allocation4] sm:$0xff]  ;;  %v224_v27 = vld [vmem:[#allocation4 + $0x8] sm:$0xff] }
  0x3d   :  { %432 = vmatpush3.bf16.msra.mxu0 %v450_v1  ;;  %435 = vmatprep.mubr.msk.bf16.mxu0 %vm612_vm1, %v611_v0 }
  0x3e   :  { %433 = vmatprep.subr.bf16.mxu0 %v611_v0 }
  0x41   :  { %434 = vmatpush3.bf16.msra.mxu0 %v451_v2 }
  0x44   :  { %436 = vmatmul.mubr.msk.bf16.vlgmr.msra.gmra.mxu0 %vm85_vm0, %v454_v5 }
  0xfc   :  { %v155_v8 = vpop.f32.mrf.mxu0  ;;  %v212_v9 = vpop.f32.mrf.mxu1 }
  0xfd   :  { %v162_v10 = vadd.f32 %v155_v8, %v96_v6  ;;  %v219_v11 = vadd.f32 %v212_v9, %v166_v7 }
  0xfe   :  { %v421_v12 = vpop.f32.mrf.mxu0  ;;  %v429_v14 = vpop.f32.mrf.mxu1 }
  0xff   :  { %164 = vst.msk [vmem:[#allocation2] sm:$0xff] %vm85_vm0, %v162_v10  ;;  %221 = vst.msk [vmem:[#allocation3] sm:$0xff] %vm85_vm0, %v219_v11 }
 0x100   :  { %v158_v16 = vpop.f32.mrf.mxu0  ;;  %v215_v17 = vpop.f32.mrf.mxu1 }
 0x101   :  { %v163_v18 = vadd.f32 %v158_v16, %v97_v13  ;;  %v220_v19 = vadd.f32 %v215_v17, %v167_v15 }
 0x102   :  { %v422_v20 = vpop.f32.mrf.mxu0  ;;  %v430_v21 = vpop.f32.mrf.mxu1 }
 0x103   :  { %165 = vst.msk [vmem:[#allocation2 + $0x8] sm:$0xff] %vm85_vm0, %v163_v18  ;;  %222 = vst.msk [vmem:[#allocation3 + $0x8] sm:$0xff] %vm85_vm0, %v220_v19 }
 0x104   :  { %v269_v23 = vpop.f32.mrf.mxu0 }
 0x105   :  { %v276_v25 = vadd.f32 %v269_v23, %v223_v22 }
 0x106   :  { %v437_v26 = vpop.f32.mrf.mxu0  ;;  %v307_v28 = vld [vmem:[#allocation3] sm:$0xff]  ;;  %v284_v29 = vld [vmem:[#allocation2] sm:$0xff] }
 0x107   :  { %278 = vst.msk [vmem:[#allocation4] sm:$0xff] %vm85_vm0, %v276_v25  ;;  %v309_v30 = vadd.f32 %v393_v24, %v307_v28  ;;  %v292_v31 = vadd.f32 %v393_v24, %v284_v29 }
 0x108   :  { %v272_v32 = vpop.f32.mrf.mxu0 }
 0x109   :  { %v277_v33 = vadd.f32 %v272_v32, %v224_v27  ;;  %v402_v34 = vpack.c.bf16 %v309_v30, %v309_v30  ;;  %v294_v35 = vmul.f32 0.35355338, %v292_v31 }
 0x10a   :  { %v438_v36 = vpop.f32.mrf.mxu0  ;;  %v308_v37 = vld [vmem:[#allocation3 + $0x8] sm:$0xff]  ;;  %v285_v38 = vld [vmem:[#allocation2 + $0x8] sm:$0xff] }
 0x10b   :  { %279 = vst.msk [vmem:[#allocation4 + $0x8] sm:$0xff] %vm85_vm0, %v277_v33  ;;  %v310_v39 = vadd.f32 %v393_v24, %v308_v37  ;;  %v293_v40 = vadd.f32 %v393_v24, %v285_v38  ;;  %v400_v41 = vpack.c.bf16 %v294_v35, %v294_v35 }
 0x10c   :  { %319 = vst.msk [vmem:[#allocation14] sm:$0xf] %vm304_vm2, %v402_v34 }
 0x10d   :  { %v403_v42 = vpack.c.bf16 %v310_v39, %v310_v39  ;;  %v295_v43 = vmul.f32 0.35355338, %v293_v40  ;;  %305 = vst.msk [vmem:[#allocation13] sm:$0xf] %vm304_vm2, %v400_v41 }
 0x10e   :  { %v321_v44 = vld [vmem:[#allocation4] sm:$0xff] }
 0x10f   :  { %320 = vst.msk [vmem:[#allocation14 + $0x4] sm:$0xf] %vm304_vm2, %v403_v42  ;;  %v401_v45 = vpack.c.bf16 %v295_v43, %v295_v43  ;;  %v323_v46 = vadd.f32 %v393_v24, %v321_v44 }
 0x110   :  { %546 = shalt.err (!%p543_p10)
}
 0x111   :  { %358 = dma.vmem_to_hbm [thread:$0]  %s353_s22, 128, %s731_s6, [#allocation15], %s607_s29, %s607_s29, %s608_s30   ;;  %306 = vst.msk [vmem:[#allocation13 + $0x4] sm:$0xf] %vm304_vm2, %v401_v45  ;;  %v404_v47 = vpack.c.bf16 %v323_v46, %v323_v46 }
 0x112   :  { %s615_s27 = smov [#allocation16]   ;;  %s555_s8 = scalar_lea.vmem %s341_s23, 128 }
 0x113   :  { %s364_s28 = sshll.u32 %s615_s27, 4  ;;  %p556_p11 = scmp.ne.s32.totalorder %s341_s23, %s555_s8  ;;  %s365_s28 = int_to_ptr.vmem [resolvable:$true] %s364_s28 }
 0x114   :  { %p560_p12 = scmp.lt.s32.totalorder %s341_s23, %s341_s23  ;;  %p561_p13 = scmp.lt.s32.totalorder %s555_s8, %s555_s8 }
 0x116   :  { %p562_p0 = por %p561_p13, %p560_p12 }
 0x118   :  { %p563_p1 = pnand %p562_p0, %p556_p11 }
 0x11a   :  { %566 = shalt.err (!%p563_p1)
}
 0x11b   :  { %346 = dma.vmem_to_hbm [thread:$0]  %s341_s23, 128, %s730_s5, [#allocation7], %s607_s29, %s607_s29, %s608_s30   ;;  %v322_v48 = vld [vmem:[#allocation4 + $0x8] sm:$0xff]  ;;  %333 = vst.msk [vmem:[#allocation16] sm:$0xf] %vm304_vm2, %v404_v47 }
 0x11c   :  { %v324_v49 = vadd.f32 %v393_v24, %v322_v48  ;;  %s575_s6 = scalar_lea.vmem %s365_s28, 128  ;;  %p580_p3 = scmp.lt.s32.totalorder %s365_s28, %s365_s28 }
 0x11d   :  { %p576_p2 = scmp.ne.s32.totalorder %s365_s28, %s575_s6  ;;  %p581_p4 = scmp.lt.s32.totalorder %s575_s6, %s575_s6 }
 0x11e   :  { %v405_v50 = vpack.c.bf16 %v324_v49, %v324_v49 }
 0x11f   :  { %p582_p5 = por %p581_p4, %p580_p3 }
 0x120   :  { %334 = vst.msk [vmem:[#allocation16 + $0x4] sm:$0xf] %vm304_vm2, %v405_v50 }
 0x121   :  { %p583_p6 = pnand %p582_p5, %p576_p2 }
 0x123   :  { %586 = shalt.err (!%p583_p6)
}
 0x124   :  { %370 = dma.vmem_to_hbm [thread:$0]  %s365_s28, 128, %s732_s7, [#allocation15], %s607_s29, %s607_s29, %s608_s30  }
 0x125   :  { %601 = dma.done.wait [#allocation7], 128  }
 0x126   :  { %602 = vsyncadd [#allocation7], 4294967168 }
 0x127   :  { %603 = dma.done.wait [#allocation15], 256  }
 0x128   :  { %604 = vsyncadd [#allocation15], 4294967040 }
 0x129   :  { %380 = vsyncpa [#allocation6], 1 }
 0x12a   :  { %381 = vsyncpa [#allocation9], 1 }
 0x12b   :  { %382 = vsyncpa [#allocation12], 1 }
 0x12c   :  { %383 = vsyncpa [#allocation7], 1 }
 0x12d   :  { %384 = vsyncpa [#allocation15], 1 }

</bundles_post_ra>
